<compile_context>
chip_gen: v6e
topology: v6e:2x2x1
jax: 0.10.0
libtpu: 0.0.40
codegen_flags: <defaults>
</compile_context>

<pallas_src>
import jax
import jax.numpy as jnp
from jax.experimental import pallas as pl
from jax.experimental.pallas import tpu as pltpu


_LANES = 128


def _ntxent_kernel(inv_t_ref, anchor_ref, positive_ref, negatives_ref, loss_ref):
    """One batch tile of NT-Xent; writes one loss per row, broadcast across lanes."""
    eps_sq = jnp.float32(1e-24)  # (1e-12)**2 == torch F.normalize eps, squared
    inv_t = inv_t_ref[0]

    a = anchor_ref[...].astype(jnp.float32)     # [TB, D]
    p = positive_ref[...].astype(jnp.float32)   # [TB, D]
    n = negatives_ref[...].astype(jnp.float32)  # [TB, N, D]

    # F.normalize(x) == x * rsqrt(max(sum(x*x), eps^2)); rsqrt runs on the EUP.
    a_inv = jax.lax.rsqrt(jnp.maximum(jnp.sum(a * a, axis=-1, keepdims=True), eps_sq))
    a = a * (a_inv * inv_t)  # fold 1/temperature into the normalized anchor once

    # Positive/negative norms are applied to the reduced similarities below instead
    # of rescaling the full tensors (saves a [TB, N, D] VPU multiply).
    p_inv = jax.lax.rsqrt(jnp.maximum(jnp.sum(p * p, axis=-1, keepdims=True), eps_sq))  # [TB,1]
    n_inv = jax.lax.rsqrt(jnp.maximum(jnp.sum(n * n, axis=-1), eps_sq))                 # [TB,N]

    pos = jnp.sum(a * p, axis=-1, keepdims=True) * p_inv         # [TB, 1]
    neg = jnp.sum(n * a[:, None, :], axis=-1) * n_inv            # [TB, N]

    # Cross-entropy with label 0 over logits [pos | neg] == -pos + logsumexp(logits).
    m = jnp.maximum(pos, jnp.max(neg, axis=-1, keepdims=True))   # [TB, 1]
    lse = m + jnp.log(jnp.exp(pos - m)
                      + jnp.sum(jnp.exp(neg - m), axis=-1, keepdims=True))
    row_loss = lse - pos                                         # [TB, 1]

    # Lane-dense store: broadcast each row's loss across the 128 output lanes.
    loss_ref[...] = jnp.broadcast_to(row_loss, loss_ref.shape)


def _round_up(x, m):
    return ((x + m - 1) // m) * m


def _vmem_capacity_bytes():
    try:
        return int(pltpu.get_tpu_info().vmem_capacity_bytes)
    except Exception:
        return 64 * 1024 * 1024  # v7x per-TensorCore VMEM; safe floor for all gens


def _pick_batch_tile(B, N, D, in_itemsize, vmem_bytes):
    """Largest batch tile whose double-buffered blocks + f32 working set fit VMEM."""
    bytes_per_row = (
        2 * (N * D + 2 * D) * in_itemsize   # double-buffered input blocks
        + 2 * _LANES * 4                    # double-buffered (TB, 128) f32 output block
        + (N * D + 2 * D + 2 * N + 8) * 4   # in-kernel f32 working set (negatives copy etc.)
    )
    budget = int(vmem_bytes * 0.6)          # headroom for scratch / regalloc
    tb = budget // max(bytes_per_row, 1)
    tb = min(tb, 1024)                      # ~0.35us/step overhead is long amortized by here
    tb = min(tb, _round_up(B, 8))           # never exceed the (padded) batch
    tb = max((tb // 8) * 8, 8)              # sublane multiple
    return tb


def ntxent_loss(anchor, positive, negatives, temperature=0.5):
    B, D = anchor.shape
    _, N, _ = negatives.shape
    in_itemsize = jnp.dtype(anchor.dtype).itemsize

    vmem_cap = _vmem_capacity_bytes()
    tb = _pick_batch_tile(B, N, D, in_itemsize, vmem_cap)

    num_tiles = pl.cdiv(B, tb)
    b_pad = num_tiles * tb
    if b_pad != B:
        # Zero-pad the tail tile (padded rows produce finite values and are dropped
        # before the mean, so the mean stays exact over the true batch B).
        pad = b_pad - B
        anchor = jnp.pad(anchor, ((0, pad), (0, 0)))
        positive = jnp.pad(positive, ((0, pad), (0, 0)))
        negatives = jnp.pad(negatives, ((0, pad), (0, 0), (0, 0)))

    inv_t = jnp.asarray([1.0 / temperature], dtype=jnp.float32)

    per_row = pl.pallas_call(
        _ntxent_kernel,
        out_shape=jax.ShapeDtypeStruct((b_pad, _LANES), jnp.float32),
        grid=(num_tiles,),
        in_specs=[
            pl.BlockSpec(memory_space=pltpu.MemorySpace.SMEM),   # 1/temperature scalar
            pl.BlockSpec((tb, D), lambda i: (i, 0)),             # anchor tile
            pl.BlockSpec((tb, D), lambda i: (i, 0)),             # positive tile
            pl.BlockSpec((tb, N, D), lambda i: (i, 0, 0)),       # negatives tile
        ],
        out_specs=pl.BlockSpec((tb, _LANES), lambda i: (i, 0)),
        compiler_params=pltpu.CompilerParams(
            dimension_semantics=("parallel",),                   # independent tiles -> v7x megacore
            vmem_limit_bytes=int(min(vmem_cap, 128 * 1024 * 1024)),
        ),
    )(inv_t, anchor, positive, negatives)

    # Mean over the true batch; lane 0 of each row holds that row's loss.
    return jnp.mean(per_row[:B, 0])


def _reference_loss(anchor, positive, negatives, temperature=0.5):
    eps = 1e-12
    a = anchor / jnp.maximum(jnp.linalg.norm(anchor, axis=1, keepdims=True), eps)
    p = positive / jnp.maximum(jnp.linalg.norm(positive, axis=1, keepdims=True), eps)
    n = negatives / jnp.maximum(jnp.linalg.norm(negatives, axis=2, keepdims=True), eps)
    pos = jnp.sum(a * p, axis=1) / temperature
    neg = jnp.einsum("bnd,bd->bn", n, a) / temperature
    logits = jnp.concatenate([pos[:, None], neg], axis=1)
    lse = jax.scipy.special.logsumexp(logits, axis=1)
    return jnp.mean(lse - logits[:, 0])


if __name__ == "__main__":
    # Small deterministic shapes consistent with the module:
    # batch=8, feature_dim=32, num_negatives=8.
    B, D, N = 8, 32, 8
    key = jax.random.PRNGKey(0)
    k1, k2, k3 = jax.random.split(key, 3)
    anchor = jax.random.normal(k1, (B, D), dtype=jnp.float32)
    positive = jax.random.normal(k2, (B, D), dtype=jnp.float32)
    negatives = jax.random.normal(k3, (B, N, D), dtype=jnp.float32)

    loss = ntxent_loss(anchor, positive, negatives, temperature=0.5)
    loss = jax.block_until_ready(loss)

    ref = _reference_loss(anchor, positive, negatives, temperature=0.5)
    assert jnp.allclose(loss, ref, atol=1e-4, rtol=1e-4), (loss, ref)

    print("KERNEL_OK")
</pallas_src>

<mosaic_0001>
module attributes {stable_mosaic.version = 11 : i64} {
  func.func @_ntxent_kernel(%arg0: i32, %arg1: memref<1xf32, #tpu.memory_space<smem>>, %arg2: memref<8x32xf32, #tpu.memory_space<vmem>>, %arg3: memref<8x32xf32, #tpu.memory_space<vmem>>, %arg4: memref<8x8x32xf32, #tpu.memory_space<vmem>>, %arg5: memref<8x128xf32, #tpu.memory_space<vmem>>) attributes {dimension_semantics = [#tpu.dimension_semantics<parallel>], iteration_bounds = array<i64: 1>, scalar_prefetch = 0 : i64, scratch_operands = 0 : i64, tpu.core_type = #tpu.core_type<tc>, window_params = [{transform_indices = @transform_0, window_bounds = array<i64: 1>}, {transform_indices = @transform_1, window_bounds = array<i64: 8, 32>}, {transform_indices = @transform_2, window_bounds = array<i64: 8, 32>}, {transform_indices = @transform_3, window_bounds = array<i64: 8, 8, 32>}, {transform_indices = @transform_4, window_bounds = array<i64: 8, 128>}]} {
    %c0 = arith.constant 0 : index
    %0 = memref.load %arg1[%c0] : memref<1xf32, #tpu.memory_space<smem>>
    %c0_0 = arith.constant 0 : index
    %c0_1 = arith.constant 0 : index
    %1 = vector.load %arg2[%c0_0, %c0_1] : memref<8x32xf32, #tpu.memory_space<vmem>>, vector<8x32xf32>
    %c0_2 = arith.constant 0 : index
    %c0_3 = arith.constant 0 : index
    %2 = vector.load %arg3[%c0_2, %c0_3] : memref<8x32xf32, #tpu.memory_space<vmem>>, vector<8x32xf32>
    %c0_4 = arith.constant 0 : index
    %c0_5 = arith.constant 0 : index
    %c0_6 = arith.constant 0 : index
    %3 = vector.load %arg4[%c0_4, %c0_5, %c0_6] : memref<8x8x32xf32, #tpu.memory_space<vmem>>, vector<8x8x32xf32>
    %4 = arith.mulf %1, %1 : vector<8x32xf32>
    %cst = arith.constant dense<0.000000e+00> : vector<8xf32>
    %5 = vector.multi_reduction <add>, %4, %cst [1] : vector<8x32xf32> to vector<8xf32>
    %6 = vector.shape_cast %5 : vector<8xf32> to vector<8x1xf32>
    %cst_7 = arith.constant 1.000000e-24 : f32
    %7 = vector.broadcast %cst_7 : f32 to vector<8x1xf32>
    %8 = arith.maximumf %6, %7 : vector<8x1xf32>
    %9 = math.rsqrt %8 : vector<8x1xf32>
    %10 = vector.broadcast %0 : f32 to vector<8x1xf32>
    %11 = arith.mulf %9, %10 : vector<8x1xf32>
    %12 = vector.broadcast %11 : vector<8x1xf32> to vector<8x32xf32>
    %13 = arith.mulf %1, %12 : vector<8x32xf32>
    %14 = arith.mulf %2, %2 : vector<8x32xf32>
    %cst_8 = arith.constant dense<0.000000e+00> : vector<8xf32>
    %15 = vector.multi_reduction <add>, %14, %cst_8 [1] : vector<8x32xf32> to vector<8xf32>
    %16 = vector.shape_cast %15 : vector<8xf32> to vector<8x1xf32>
    %cst_9 = arith.constant 1.000000e-24 : f32
    %17 = vector.broadcast %cst_9 : f32 to vector<8x1xf32>
    %18 = arith.maximumf %16, %17 : vector<8x1xf32>
    %19 = math.rsqrt %18 : vector<8x1xf32>
    %20 = arith.mulf %3, %3 : vector<8x8x32xf32>
    %cst_10 = arith.constant dense<0.000000e+00> : vector<8x8xf32>
    %21 = vector.multi_reduction <add>, %20, %cst_10 [2] : vector<8x8x32xf32> to vector<8x8xf32>
    %cst_11 = arith.constant 1.000000e-24 : f32
    %22 = vector.broadcast %cst_11 : f32 to vector<8x8xf32>
    %23 = arith.maximumf %21, %22 : vector<8x8xf32>
    %24 = math.rsqrt %23 : vector<8x8xf32>
    %25 = arith.mulf %13, %2 : vector<8x32xf32>
    %cst_12 = arith.constant dense<0.000000e+00> : vector<8xf32>
    %26 = vector.multi_reduction <add>, %25, %cst_12 [1] : vector<8x32xf32> to vector<8xf32>
    %27 = vector.shape_cast %26 : vector<8xf32> to vector<8x1xf32>
    %28 = arith.mulf %27, %19 : vector<8x1xf32>
    %29 = vector.shape_cast %13 : vector<8x32xf32> to vector<8x1x32xf32>
    %30 = vector.broadcast %29 : vector<8x1x32xf32> to vector<8x8x32xf32>
    %31 = arith.mulf %3, %30 : vector<8x8x32xf32>
    %cst_13 = arith.constant dense<0.000000e+00> : vector<8x8xf32>
    %32 = vector.multi_reduction <add>, %31, %cst_13 [2] : vector<8x8x32xf32> to vector<8x8xf32>
    %33 = arith.mulf %32, %24 : vector<8x8xf32>
    %cst_14 = arith.constant dense<0xFF800000> : vector<8xf32>
    %34 = vector.multi_reduction <maximumf>, %33, %cst_14 [1] : vector<8x8xf32> to vector<8xf32>
    %35 = vector.shape_cast %34 : vector<8xf32> to vector<8x1xf32>
    %36 = arith.maximumf %28, %35 : vector<8x1xf32>
    %37 = arith.subf %28, %36 : vector<8x1xf32>
    %38 = math.exp %37 : vector<8x1xf32>
    %39 = vector.broadcast %36 : vector<8x1xf32> to vector<8x8xf32>
    %40 = arith.subf %33, %39 : vector<8x8xf32>
    %41 = math.exp %40 : vector<8x8xf32>
    %cst_15 = arith.constant dense<0.000000e+00> : vector<8xf32>
    %42 = vector.multi_reduction <add>, %41, %cst_15 [1] : vector<8x8xf32> to vector<8xf32>
    %43 = vector.shape_cast %42 : vector<8xf32> to vector<8x1xf32>
    %44 = arith.addf %38, %43 : vector<8x1xf32>
    %45 = math.log %44 : vector<8x1xf32>
    %46 = arith.addf %36, %45 : vector<8x1xf32>
    %47 = arith.subf %46, %28 : vector<8x1xf32>
    %48 = vector.shape_cast %47 : vector<8x1xf32> to vector<8x1xf32>
    %49 = vector.broadcast %48 : vector<8x1xf32> to vector<8x128xf32>
    %c0_16 = arith.constant 0 : index
    %c0_17 = arith.constant 0 : index
    %50 = vector.load %arg5[%c0_16, %c0_17] : memref<8x128xf32, #tpu.memory_space<vmem>>, vector<8x128xf32>
    tpu.vector_store %arg5[%c0_16, %c0_17], %49 {strides = array<i32>} : memref<8x128xf32, #tpu.memory_space<vmem>>, vector<8x128xf32>,
    return
  }
  func.func @transform_0(%arg0: i32) -> i32 {
    %c0_i32 = arith.constant 0 : i32
    %c0_i32_0 = arith.constant 0 : i32
    return %c0_i32 : i32
  }
  func.func @transform_1(%arg0: i32) -> (i32, i32) {
    %c0_i32 = arith.constant 0 : i32
    %c0_i32_0 = arith.constant 0 : i32
    return %arg0, %c0_i32 : i32, i32
  }
  func.func @transform_2(%arg0: i32) -> (i32, i32) {
    %c0_i32 = arith.constant 0 : i32
    %c0_i32_0 = arith.constant 0 : i32
    return %arg0, %c0_i32 : i32, i32
  }
  func.func @transform_3(%arg0: i32) -> (i32, i32, i32) {
    %c0_i32 = arith.constant 0 : i32
    %c0_i32_0 = arith.constant 0 : i32
    %c0_i32_1 = arith.constant 0 : i32
    return %arg0, %c0_i32, %c0_i32_0 : i32, i32, i32
  }
  func.func @transform_4(%arg0: i32) -> (i32, i32) {
    %c0_i32 = arith.constant 0 : i32
    %c0_i32_0 = arith.constant 0 : i32
    return %arg0, %c0_i32 : i32, i32
  }
}

</mosaic_0001>

<bundles_post_ra>
// kernel: tpu_custom_call.1
= control target key start
LH: loop header
LB: loop body
LE: loop exit
PB: predicated region body
PF: predicated region fallthrough
CT: control target
= control target key end

     0   :  { %10 = vsyncpa [#allocation4], 0  ;;  %s827_s0 = inlined_call_operand.<no memory space> [shape: f32[1], index: 0, kind: input, shape index: {}]   ;;  %s828_s1 = inlined_call_operand.hbm [shape: f32[8,32], index: 1, kind: input, shape index: {}]   ;;  %s829_s2 = inlined_call_operand.hbm [shape: f32[8,32], index: 2, kind: input, shape index: {}]   ;;  %s830_s3 = inlined_call_operand.hbm [shape: f32[8,8,32], index: 3, kind: input, shape index: {}]   ;;  %s831_s4 = inlined_call_operand.hbm [shape: f32[8,128], index: 4, kind: output, shape index: {}]  }
   0x1   :  { %11 = vsyncpa [#allocation7], 0 }
   0x2   :  { %12 = vsyncpa [#allocation5], 0  ;;  %s629_s15 = smov [#allocation6]   ;;  %s630_s17 = smov [#allocation3]  }
   0x3   :  { %s31_s16 = sshll.u32 %s629_s15, 4  ;;  %s21_s18 = sshll.u32 %s630_s17, 4  ;;  %s32_s16 = int_to_ptr.vmem [resolvable:$true] %s31_s16  ;;  %s22_s18 = int_to_ptr.vmem [resolvable:$true] %s21_s18 }
   0x4   :  { %s551_s19 = scalar_lea.vmem %s32_s16, 128  ;;  %p556_p1 = scmp.lt.s32.totalorder %s32_s16, %s32_s16 }
   0x5   :  { %p552_p0 = scmp.ne.s32.totalorder %s32_s16, %s551_s19  ;;  %p557_p2 = scmp.lt.s32.totalorder %s551_s19, %s551_s19 }
   0x7   :  { %p558_p3 = por %p557_p2, %p556_p1 }
   0x9   :  { %p559_p4 = pnand %p558_p3, %p552_p0 }
   0xb   :  { %562 = shalt.err (!%p559_p4)
}
   0xc   :  { %34 = dma.hbm_to_vmem [thread:$0]  %s829_s2, 128, %s32_s16, [#allocation7]  }
   0xd   :  { %s571_s22 = scalar_lea.vmem %s22_s18, 128  ;;  %p576_p6 = scmp.lt.s32.totalorder %s22_s18, %s22_s18 }
   0xe   :  { %p572_p5 = scmp.ne.s32.totalorder %s22_s18, %s571_s22  ;;  %p577_p7 = scmp.lt.s32.totalorder %s571_s22, %s571_s22 }
  0x10   :  { %p578_p8 = por %p577_p7, %p576_p6 }
  0x12   :  { %p579_p9 = pnand %p578_p8, %p572_p5 }
  0x14   :  { %582 = shalt.err (!%p579_p9)
}
  0x15   :  { %24 = dma.hbm_to_vmem [thread:$0]  %s828_s1, 128, %s22_s18, [#allocation4]  }
  0x16   :  { %s631_s25 = smov [#allocation8]  }
  0x17   :  { %s40_s26 = sshll.u32 %s631_s25, 4  ;;  %s41_s26 = int_to_ptr.vmem [resolvable:$true] %s40_s26 }
  0x18   :  { %s591_s27 = scalar_lea.vmem %s41_s26, 1024  ;;  %p596_p11 = scmp.lt.s32.totalorder %s41_s26, %s41_s26 }
  0x19   :  { %p592_p10 = scmp.ne.s32.totalorder %s41_s26, %s591_s27  ;;  %p597_p12 = scmp.lt.s32.totalorder %s591_s27, %s591_s27 }
  0x1b   :  { %p598_p13 = por %p597_p12, %p596_p11 }
  0x1d   :  { %p599_p0 = pnand %p598_p13, %p592_p10 }
  0x1f   :  { %602 = shalt.err (!%p599_p0)
}
  0x20   :  { %s632_s2 = smov 128   ;;  %s633_s28 = smov 8  }
  0x21   :  { %46 = dma.hbm_to_vmem [thread:$0]  %s830_s3, 1024, %s41_s26, [#allocation7], %s632_s2, %s632_s2, %s633_s28  }
  0x22   :  { %623 = dma.done.wait [#allocation4], 128  }
  0x23   :  { %624 = vsyncadd [#allocation4], 4294967168 }
  0x24   :  { %625 = dma.done.wait [#allocation7], 1152  }
  0x25   :  { %626 = vsyncadd [#allocation7], 4294966144  ;;  %v57_v0 = vld [vmem:[#allocation3] sm:$0xff]  ;;  %vm68_vm0 = vcmask 261120   ;;  %v672_v3 = vld [vmem:[#allocation8 + $0x8] sm:$0xff]  ;;  %v141_v31 = vlaneseq  ;;  %v74_v34 = vstv %s827_s0  ;;  %vm308_vm1 = vcmask 1041409  }
  0x26   :  { %v67_v1 = vmul.f32 %v57_v0, %v57_v0  ;;  %v59_v4 = vld [vmem:[#allocation8] sm:$0xff]  ;;  %v674_v5 = vld [vmem:[#allocation8 + $0x10] sm:$0xff]  ;;  %v84_v6 = vmul.f32 %v672_v3, %v672_v3  ;;  %v680_v9 = vld [vmem:[#allocation8 + $0x18] sm:$0xff]  ;;  %v634_v29 = vmov 1966171168   ;;  %vm310_vm2 = vcmask 1042434  }
  0x27   :  { %v83_v7 = vmul.f32 %v59_v4, %v59_v4  ;;  %v85_v8 = vmul.f32 %v674_v5, %v674_v5  ;;  %v86_v10 = vmul.f32 %v680_v9, %v680_v9  ;;  %v684_v11 = vld [vmem:[#allocation8 + $0x20] sm:$0xff]  ;;  %v686_v12 = vld [vmem:[#allocation8 + $0x28] sm:$0xff]  ;;  %v696_v19 = vld [vmem:[#allocation8 + $0x30] sm:$0xff]  ;;  %v139_v30 = vunpack.c.l.s4 %v634_v29  ;;  %s636_s0 = smov [#allocation9]  }
  0x28   :  { %v69_v2 = vsel %vm68_vm0, %v67_v1, 0.0  ;;  %v94_v13 = vsel %vm68_vm0, %v84_v6, 0.0  ;;  %v87_v17 = vmul.f32 %v684_v11, %v684_v11  ;;  %v88_v18 = vmul.f32 %v686_v12, %v686_v12  ;;  %v698_v20 = vld [vmem:[#allocation8 + $0x38] sm:$0xff]  ;;  %s483_s5 = sshll.u32 %s636_s0, 4  ;;  %s484_s5 = int_to_ptr.vmem [resolvable:$true] %s483_s5 }
  0x29   :  { %70 = vadd.xlane.f32.xlu0 %v69_v2  ;;  %v91_v14 = vsel %vm68_vm0, %v83_v7, 0.0  ;;  %95 = vadd.xlane.f32.xlu1 %v94_v13  ;;  %v97_v15 = vsel %vm68_vm0, %v85_v8, 0.0  ;;  %v100_v16 = vsel %vm68_vm0, %v86_v10, 0.0  ;;  %v89_v23 = vmul.f32 %v696_v19, %v696_v19  ;;  %s603_s6 = scalar_lea.vmem %s484_s5, 128  ;;  %p608_p2 = scmp.lt.s32.totalorder %s484_s5, %s484_s5 }
  0x2a   :  { %v103_v21 = vsel %vm68_vm0, %v87_v17, 0.0  ;;  %v106_v22 = vsel %vm68_vm0, %v88_v18, 0.0  ;;  %v90_v24 = vmul.f32 %v698_v20, %v698_v20  ;;  %v140_v32 = vunpack.c.0.s8 %v139_v30  ;;  %p604_p1 = scmp.ne.s32.totalorder %s484_s5, %s603_s6  ;;  %p609_p3 = scmp.lt.s32.totalorder %s603_s6, %s603_s6 }
  0x2b   :  { %v109_v25 = vsel %vm68_vm0, %v89_v23, 0.0  ;;  %v709_v33 = vshrl.u32 %v141_v31, 7  ;;  %vm312_vm3 = vcmask 1043459   ;;  %vm314_vm4 = vcmask 1044484  }
  0x2c   :  { %v112_v26 = vsel %vm68_vm0, %v90_v24, 0.0  ;;  %vm316_vm5 = vcmask 1045509   ;;  %vm318_vm6 = vcmask 1046534   ;;  %vm320_vm7 = vcmask 1047559   ;;  %p610_p4 = por %p609_p3, %p608_p2 }
  0x2d   :  { %92 = vadd.xlane.f32.xlu0 %v91_v14  ;;  %98 = vadd.xlane.f32.xlu1 %v97_v15  ;;  %v143_v37 = vsub.s32 %v140_v32, %v709_v33  ;;  %v716_v40 = vsub.s32 0, %v709_v33  ;;  %vm323_vm8 = vcmask 64512  }
  0x2e   :  { %p611_p5 = pnand %p610_p4, %p604_p1 }
  0x31   :  { %101 = vadd.xlane.f32.xlu0 %v100_v16  ;;  %104 = vadd.xlane.f32.xlu1 %v103_v21 }
  0x35   :  { %107 = vadd.xlane.f32.xlu0 %v106_v22  ;;  %110 = vadd.xlane.f32.xlu1 %v109_v25 }
  0x39   :  { %113 = vadd.xlane.f32.xlu0 %v112_v26 }
  0xb2   :  { %v71_v27 = vpop.xlane.xlu0 %70  ;;  %v96_v18 = vpop.xlane.xlu1 %95 }
  0xb3   :  { %v72_v28 = vmax.f32 %v71_v27, 1e-24  ;;  %v116_v23 = vmax.f32 %v96_v18, 1e-24 }
  0xb5   :  { %503 = vrsqrt.f32 %v72_v28 }
  0xb6   :  { %v99_v21 = vpop.xlane.xlu1 %98 }
  0xb7   :  { %v117_v25 = vmax.f32 %v99_v21, 1e-24  ;;  %v338_v21 = vsub.s32 1, %v709_v33 }
  0xba   :  { %v105_v24 = vpop.xlane.xlu1 %104 }
  0xbb   :  { %v119_v28 = vmax.f32 %v105_v24, 1e-24  ;;  %v346_v24 = vsub.s32 3, %v709_v33 }
  0xbe   :  { %v111_v29 = vpop.xlane.xlu1 %110 }
  0xc2   :  { %v504_v35 = vpop.eup %503 }
  0xc3   :  { %v75_v36 = vmul.f32 %v504_v35, %v74_v34  ;;  %v121_v34 = vmax.f32 %v111_v29, 1e-24 }
  0xc5   :  { %v76_v38 = vmul.f32 %v75_v36, %v57_v0  ;;  %v275_v36 = vand.u32 127, %v141_v31 }
  0xc7   :  { %v144_v39 = vrot.slane %v76_v38, %v143_v37  ;;  %v137_v41 = vcombine.high %v76_v38, %v76_v38 }
  0xc9   :  { %v160_v42 = vrot.slane %v144_v39, %v143_v37  ;;  %v152_v43 = vcombine.high %v144_v39, %v144_v39  ;;  %v151_v44 = vrot.slane %v137_v41, %v143_v37  ;;  %v745_v41 = vsub.s32 %v275_v36, %v709_v33 }
  0xcb   :  { %v189_v45 = vrot.slane %v160_v42, %v716_v40  ;;  %v174_v46 = vrot.slane %v152_v43, %v143_v37  ;;  %v182_v47 = vcombine.high %v160_v42, %v160_v42  ;;  %v167_v48 = vrot.slane %v151_v44, %v143_v37 }
  0xcc   :  { %v153_v49 = vcombine.high %v151_v44, %v151_v44 }
  0xcd   :  { %v226_v50 = vmul.f32 %v189_v45, %v59_v4  ;;  %v193_v51 = vrot.slane %v174_v46, %v716_v40  ;;  %v197_v52 = vrot.slane %v182_v47, %v716_v40  ;;  %v184_v53 = vcombine.high %v174_v46, %v174_v46 }
  0xce   :  { %v205_v54 = vrot.slane %v167_v48, %v716_v40  ;;  %v181_v55 = vrot.slane %v153_v49, %v143_v37  ;;  %v183_v56 = vcombine.high %v167_v48, %v167_v48 }
  0xcf   :  { %v234_v57 = vsel %vm68_vm0, %v226_v50, 0.0  ;;  %v227_v58 = vmul.f32 %v193_v51, %v672_v3  ;;  %v228_v59 = vmul.f32 %v197_v52, %v674_v5  ;;  %v201_v60 = vrot.slane %v184_v53, %v716_v40 }
  0xd0   :  { %235 = vadd.xlane.f32.xlu1 %v234_v57  ;;  %v209_v63 = vrot.slane %v181_v55, %v716_v40  ;;  %v185_v0 = vcombine.high %v181_v55, %v181_v55  ;;  %v230_v2 = vmul.f32 %v205_v54, %v684_v11  ;;  %v213_v4 = vrot.slane %v183_v56, %v716_v40 }
  0xd1   :  { %v237_v61 = vsel %vm68_vm0, %v227_v58, 0.0  ;;  %v229_v62 = vmul.f32 %v201_v60, %v680_v9  ;;  %v240_v1 = vsel %vm68_vm0, %v228_v59, 0.0  ;;  %v58_v9 = vld [vmem:[#allocation6] sm:$0xff] }
  0xd2   :  { %238 = vadd.xlane.f32.xlu0 %v237_v61  ;;  %v231_v5 = vmul.f32 %v209_v63, %v686_v12  ;;  %v217_v6 = vrot.slane %v185_v0, %v716_v40  ;;  %v246_v7 = vsel %vm68_vm0, %v230_v2, 0.0  ;;  %v232_v8 = vmul.f32 %v213_v4, %v696_v19  ;;  %v93_v19 = vpop.xlane.xlu0 %92 }
  0xd3   :  { %v243_v3 = vsel %vm68_vm0, %v229_v62, 0.0  ;;  %v77_v13 = vmul.f32 %v58_v9, %v58_v9  ;;  %v131_v16 = vmul.f32 %v76_v38, %v58_v9 }
  0xd4   :  { %241 = vadd.xlane.f32.xlu1 %v240_v1  ;;  %v249_v10 = vsel %vm68_vm0, %v231_v5, 0.0  ;;  %v233_v11 = vmul.f32 %v217_v6, %v698_v20  ;;  %v252_v14 = vsel %vm68_vm0, %v232_v8, 0.0  ;;  %v115_v20 = vmax.f32 %v93_v19, 1e-24 }
  0xd5   :  { %v78_v15 = vsel %vm68_vm0, %v77_v13, 0.0  ;;  %v132_v17 = vsel %vm68_vm0, %v131_v16, 0.0 }
  0xd6   :  { %244 = vadd.xlane.f32.xlu0 %v243_v3  ;;  %v255_v12 = vsel %vm68_vm0, %v233_v11, 0.0  ;;  %v102_v22 = vpop.xlane.xlu0 %101  ;;  %505 = vrsqrt.f32 %v115_v20 }
  0xd7   :  { %507 = vrsqrt.f32 %v116_v23  ;;  %v118_v27 = vmax.f32 %v102_v22, 1e-24  ;;  %v342_v22 = vsub.s32 2, %v709_v33 }
  0xd8   :  { %247 = vadd.xlane.f32.xlu1 %v246_v7  ;;  %509 = vrsqrt.f32 %v117_v25 }
  0xd9   :  { %511 = vrsqrt.f32 %v118_v27 }
  0xda   :  { %250 = vadd.xlane.f32.xlu0 %v249_v10  ;;  %v108_v26 = vpop.xlane.xlu0 %107  ;;  %513 = vrsqrt.f32 %v119_v28  ;;  %v350_v28 = vsub.s32 4, %v709_v33 }
  0xdb   :  { %v120_v30 = vmax.f32 %v108_v26, 1e-24 }
  0xdc   :  { %253 = vadd.xlane.f32.xlu1 %v252_v14 }
  0xdd   :  { %515 = vrsqrt.f32 %v120_v30 }
  0xde   :  { %256 = vadd.xlane.f32.xlu0 %v255_v12  ;;  %v114_v32 = vpop.xlane.xlu0 %113  ;;  %517 = vrsqrt.f32 %v121_v34  ;;  %v635_v12 = vmov 0  }
  0xdf   :  { %v122_v35 = vmax.f32 %v114_v32, 1e-24  ;;  %502 = vset.pattern.permute.xlu1 %v635_v12  ;;  %501 = vset.pattern.permute.xlu0 %v635_v12 }
  0xe0   :  { %79 = vadd.xlane.f32.xlu1 %v78_v15 }
  0xe1   :  { %519 = vrsqrt.f32 %v122_v35 }
  0xe2   :  { %133 = vadd.xlane.f32.xlu0 %v132_v17 }
  0xe3   :  { %v506_v37 = vpop.eup %505 }
  0xe4   :  { %v508_v38 = vpop.eup %507 }
  0xe5   :  { %v510_v43 = vpop.eup %509 }
  0xe6   :  { %v512_v46 = vpop.eup %511 }
  0xe7   :  { %v514_v50 = vpop.eup %513 }
  0xea   :  { %v516_v55 = vpop.eup %515 }
  0xeb   :  { %v518_v60 = vpop.eup %517 }
  0xee   :  { %v520_v1 = vpop.eup %519 }
 0x159   :  { %v236_v39 = vpop.xlane.xlu1 %235 }
 0x15a   :  { %v747_v42 = vmul.f32 %v506_v37, %v236_v39  ;;  %v354_v37 = vsub.s32 5, %v709_v33 }
 0x15b   :  { %v239_v44 = vpop.xlane.xlu0 %238 }
 0x15c   :  { %v749_v45 = vmul.f32 %v508_v38, %v239_v44  ;;  %v279_v31 = vrot.slane %v747_v42, %v745_v41 }
 0x15d   :  { %v242_v47 = vpop.xlane.xlu1 %241 }
 0x15e   :  { %v283_v48 = vrot.slane %v749_v45, %v745_v41  ;;  %v755_v49 = vmul.f32 %v510_v43, %v242_v47  ;;  %v358_v43 = vsub.s32 6, %v709_v33 }
 0x15f   :  { %v245_v51 = vpop.xlane.xlu0 %244 }
 0x160   :  { %v309_v52 = vsel %vm308_vm1, %v283_v48, %v279_v31  ;;  %v287_v53 = vrot.slane %v755_v49, %v745_v41  ;;  %v760_v54 = vmul.f32 %v512_v46, %v245_v51  ;;  %v362_v46 = vsub.s32 7, %v709_v33 }
 0x161   :  { %v248_v56 = vpop.xlane.xlu1 %247 }
 0x162   :  { %v311_v57 = vsel %vm310_vm2, %v287_v53, %v309_v52  ;;  %v291_v58 = vrot.slane %v760_v54, %v745_v41  ;;  %v262_v59 = vmul.f32 %v514_v50, %v248_v56 }
 0x163   :  { %v251_v61 = vpop.xlane.xlu0 %250 }
 0x164   :  { %v313_v62 = vsel %vm312_vm3, %v291_v58, %v311_v57  ;;  %v295_v63 = vrot.slane %v262_v59, %v745_v41  ;;  %v263_v0 = vmul.f32 %v516_v55, %v251_v61 }
 0x165   :  { %v254_v2 = vpop.xlane.xlu1 %253 }
 0x166   :  { %v315_v4 = vsel %vm314_vm4, %v295_v63, %v313_v62  ;;  %v299_v3 = vrot.slane %v263_v0, %v745_v41  ;;  %v264_v5 = vmul.f32 %v518_v60, %v254_v2 }
 0x167   :  { %v257_v6 = vpop.xlane.xlu0 %256 }
 0x168   :  { %v303_v7 = vrot.slane %v264_v5, %v745_v41  ;;  %v770_v8 = vmul.f32 %v520_v1, %v257_v6  ;;  %v317_v9 = vsel %vm316_vm5, %v299_v3, %v315_v4 }
 0x169   :  { %v80_v15 = vpop.xlane.xlu1 %79 }
 0x16a   :  { %v307_v10 = vrot.slane %v770_v8, %v745_v41  ;;  %v319_v11 = vsel %vm318_vm6, %v303_v7, %v317_v9  ;;  %v81_v16 = vmax.f32 %v80_v15, 1e-24 }
 0x16b   :  { %v134_v18 = vpop.xlane.xlu0 %133 }
 0x16c   :  { %v321_v13 = vsel %vm320_vm7, %v307_v10, %v319_v11  ;;  %521 = vrsqrt.f32 %v81_v16 }
 0x16d   :  { %v324_v14 = vsel %vm323_vm8, %v321_v13, -inf }
 0x16e   :  { %325 = vmax.xlane.f32.xlu1 %v324_v14 }
 0x179   :  { %v522_v17 = vpop.eup %521 }
 0x17a   :  { %v778_v19 = vmul.f32 %v522_v17, %v134_v18 }
 0x1f7   :  { %v326_v20 = vpop.xlane.xlu1 %325 }
 0x1f8   :  { %v783_v23 = vmax.f32 %v778_v19, %v326_v20 }
 0x1fa   :  { %v339_v25 = vrot.slane %v783_v23, %v338_v21  ;;  %v335_v26 = vrot.slane %v783_v23, %v716_v40  ;;  %v343_v27 = vrot.slane %v783_v23, %v342_v22  ;;  %v347_v34 = vrot.slane %v783_v23, %v346_v24 }
 0x1fb   :  { %v351_v39 = vrot.slane %v783_v23, %v350_v28  ;;  %v359_v48 = vrot.slane %v783_v23, %v358_v43  ;;  %v363_v51 = vrot.slane %v783_v23, %v362_v46  ;;  %v328_v24 = vsub.f32 %v778_v19, %v783_v23 }
 0x1fc   :  { %v373_v29 = vsub.f32 %v749_v45, %v339_v25  ;;  %v372_v30 = vsub.f32 %v747_v42, %v335_v26  ;;  %v374_v32 = vsub.f32 %v755_v49, %v343_v27  ;;  %v375_v40 = vsub.f32 %v760_v54, %v347_v34 }
 0x1fd   :  { %v376_v42 = vsub.f32 %v262_v59, %v351_v39  ;;  %v355_v45 = vrot.slane %v783_v23, %v354_v37  ;;  %v378_v50 = vsub.f32 %v264_v5, %v359_v48  ;;  %v379_v55 = vsub.f32 %v770_v8, %v363_v51 }
 0x1fe   :  { %v382_v35 = vmul.f32 1.442695, %v373_v29  ;;  %v380_v36 = vmul.f32 1.442695, %v372_v30  ;;  %v384_v38 = vmul.f32 1.442695, %v374_v32 }
 0x1ff   :  { %v386_v44 = vmul.f32 1.442695, %v375_v40  ;;  %v388_v47 = vmul.f32 1.442695, %v376_v42  ;;  %v377_v31 = vsub.f32 %v263_v0, %v355_v45  ;;  %v392_v54 = vmul.f32 1.442695, %v378_v50 }
 0x200   :  { %523 = vpow2.f32 %v382_v35  ;;  %v394_v33 = vmul.f32 1.442695, %v379_v55  ;;  %v329_v25 = vmul.f32 1.442695, %v328_v24 }
 0x201   :  { %525 = vpow2.f32 %v380_v36  ;;  %v390_v49 = vmul.f32 1.442695, %v377_v31 }
 0x202   :  { %527 = vpow2.f32 %v384_v38 }
 0x203   :  { %529 = vpow2.f32 %v386_v44 }
 0x204   :  { %531 = vpow2.f32 %v388_v47 }
 0x205   :  { %533 = vpow2.f32 %v390_v49 }
 0x206   :  { %535 = vpow2.f32 %v392_v54 }
 0x207   :  { %537 = vpow2.f32 %v394_v33 }
 0x208   :  { %539 = vpow2.f32 %v329_v25 }
 0x20d   :  { %v524_v52 = vpop.eup %523 }
 0x20e   :  { %v526_v53 = vpop.eup %525  ;;  %408 = vperm.xlu1 %502, %v524_v52  }
 0x20f   :  { %405 = vperm.xlu0 %501, %v526_v53   ;;  %v528_v56 = vpop.eup %527 }
 0x210   :  { %v530_v57 = vpop.eup %529 }
 0x211   :  { %v532_v58 = vpop.eup %531 }
 0x212   :  { %411 = vperm.xlu1 %502, %v528_v56   ;;  %v534_v59 = vpop.eup %533 }
 0x213   :  { %v536_v60 = vpop.eup %535 }
 0x214   :  { %v538_v61 = vpop.eup %537 }
 0x215   :  { %v540_v26 = vpop.eup %539 }
 0x216   :  { %414 = vperm.xlu1 %502, %v530_v57  }
 0x21a   :  { %417 = vperm.xlu1 %502, %v532_v58  }
 0x21e   :  { %420 = vperm.xlu1 %502, %v534_v59  }
 0x222   :  { %423 = vperm.xlu1 %502, %v536_v60  }
 0x226   :  { %426 = vperm.xlu1 %502, %v538_v61  }
 0x289   :  { %v409_v62 = vpop.permute.xlu1 %408 }
 0x28a   :  { %v406_v2 = vpop.permute.xlu0 %405  ;;  %v435_v3 = vrot.slane %v409_v62, %v745_v41 }
 0x28b   :  { %v431_v5 = vrot.slane %v406_v2, %v745_v41 }
 0x28d   :  { %v412_v63 = vpop.permute.xlu1 %411  ;;  %v460_v10 = vsel %vm308_vm1, %v435_v3, %v431_v5 }
 0x28e   :  { %v439_v6 = vrot.slane %v412_v63, %v745_v41 }
 0x290   :  { %v461_v13 = vsel %vm310_vm2, %v439_v6, %v460_v10 }
 0x291   :  { %v415_v0 = vpop.permute.xlu1 %414 }
 0x292   :  { %v443_v7 = vrot.slane %v415_v0, %v745_v41 }
 0x294   :  { %v462_v12 = vsel %vm312_vm3, %v443_v7, %v461_v13 }
 0x295   :  { %v418_v1 = vpop.permute.xlu1 %417 }
 0x296   :  { %v447_v8 = vrot.slane %v418_v1, %v745_v41 }
 0x298   :  { %v463_v15 = vsel %vm314_vm4, %v447_v8, %v462_v12 }
 0x299   :  { %v421_v4 = vpop.permute.xlu1 %420 }
 0x29a   :  { %v451_v11 = vrot.slane %v421_v4, %v745_v41 }
 0x29c   :  { %v464_v17 = vsel %vm316_vm5, %v451_v11, %v463_v15 }
 0x29d   :  { %v424_v9 = vpop.permute.xlu1 %423 }
 0x29e   :  { %v455_v14 = vrot.slane %v424_v9, %v745_v41 }
 0x2a0   :  { %v465_v21 = vsel %vm318_vm6, %v455_v14, %v464_v17 }
 0x2a1   :  { %v427_v16 = vpop.permute.xlu1 %426 }
 0x2a2   :  { %v459_v18 = vrot.slane %v427_v16, %v745_v41 }
 0x2a4   :  { %v466_v22 = vsel %vm320_vm7, %v459_v18, %v465_v21 }
 0x2a5   :  { %v468_v20 = vsel %vm323_vm8, %v466_v22, 0.0 }
 0x2a6   :  { %469 = vadd.xlane.f32.xlu1 %v468_v20 }
 0x32f   :  { %v470_v27 = vpop.xlane.xlu1 %469 }
 0x330   :  { %v471_v28 = vadd.f32 %v540_v26, %v470_v27 }
 0x332   :  { %541 = vlog2.f32 %v471_v28 }
 0x33f   :  { %v542_v29 = vpop.eup %541 }
 0x340   :  { %v473_v30 = vmul.f32 0.6931472, %v542_v29 }
 0x342   :  { %v474_v41 = vadd.f32 %v473_v30, %v783_v23 }
 0x344   :  { %v475_v32 = vsub.f32 %v474_v41, %v778_v19 }
 0x346   :  { %476 = vst [vmem:[#allocation9] sm:$0xff] %v475_v32 }
 0x347   :  { %614 = shalt.err (!%p611_p5)
}
 0x348   :  { %486 = dma.vmem_to_hbm [thread:$0]  %s484_s5, 128, %s831_s4, [#allocation5]  }
 0x349   :  { %627 = dma.done.wait [#allocation5], 128  }
 0x34a   :  { %628 = vsyncadd [#allocation5], 4294967168 }
 0x34b   :  { %490 = vsyncpa [#allocation4], 1 }
 0x34c   :  { %491 = vsyncpa [#allocation7], 1 }
 0x34d   :  { %492 = vsyncpa [#allocation5], 1 }

</bundles_post_ra>
